<compile_context>
chip_gen: v7x
topology: tpu7x:2x2x1
jax: 0.10.0
libtpu: 0.0.40
codegen_flags: <defaults>
</compile_context>

<pallas_src>
import functools

import jax
import jax.numpy as jnp
from jax.experimental import pallas as pl
from jax.experimental.pallas import tpu as pltpu

_NEG_INF = -1000000000.0  # matches scores.masked_fill_(attn_mask, -1e9)


def _sdpa_kernel(*refs, scale, block_q, causal, return_prob, approx_recip):
    # One (batch*head, query-tile) step: q is (TQ, D), k/v are (S, D),
    # bias (if present) is (TQ, S).
    if causal:
        q_ref, k_ref, v_ref = refs[:3]
        bias_ref = None
        out_refs = refs[3:]
    else:
        q_ref, k_ref, v_ref, bias_ref = refs[:4]
        out_refs = refs[4:]
    ctx_ref = out_refs[0]
    prob_ref = out_refs[1] if return_prob else None

    # bf16 MXU operands (native on v5e/v6e/v7x), f32 accumulation; the softmax
    # scale is folded into the small (TQ, D) q tile before the cast.
    q = (q_ref[0] * scale).astype(jnp.bfloat16)
    k = k_ref[0].astype(jnp.bfloat16)
    v = v_ref[0].astype(jnp.bfloat16)

    # scores = q @ k^T -> (TQ, S); contract last dims, no k transpose materialized.
    scores = jax.lax.dot_general(
        q, k, dimension_numbers=(((1,), (1,)), ((), ())),
        preferred_element_type=jnp.float32)

    if causal:
        # Generate the causal mask in-kernel (iota compares): zero mask DMA.
        q_start = pl.program_id(1) * block_q
        row = jax.lax.broadcasted_iota(jnp.int32, scores.shape, 0) + q_start
        col = jax.lax.broadcasted_iota(jnp.int32, scores.shape, 1)
        scores = jnp.where(col > row, jnp.float32(_NEG_INF), scores)
    else:
        # Precomputed additive bias (0 / -1e9, bf16): one VALU add instead of
        # int unpack + vcmp + vsel.  NOTE: for a row that is *entirely* masked
        # this differs from masked_fill (softmax over raw scores instead of
        # uniform); such rows do not occur with causal / padding masks.
        scores = scores + bias_ref[0].astype(jnp.float32)

    # Numerically-stable softmax over the key axis.
    row_max = jnp.max(scores, axis=-1, keepdims=True)
    e = jnp.exp(scores - row_max)
    denom = jnp.sum(e, axis=-1, keepdims=True)
    if approx_recip:
        probs = e * pl.reciprocal(denom, approx=True)   # EUP vrcp; VALU stays free
    else:
        probs = e / denom                               # exact-parity path

    # TODO(synk): pltpu.prng_random_bits-based dropout for attn_drop > 0
    # (nn.Dropout is identity at eval / attn_drop == 0).

    # context = attn_prob @ v -> (TQ, D); bf16 operands, f32 accumulation.
    ctx = jax.lax.dot_general(
        probs.astype(jnp.bfloat16), v,
        dimension_numbers=(((1,), (0,)), ((), ())),
        preferred_element_type=jnp.float32)

    ctx_ref[0] = ctx.astype(ctx_ref.dtype)
    if return_prob:
        prob_ref[0] = probs.astype(prob_ref.dtype)


def _vmem_capacity_bytes():
    try:
        cap = getattr(pltpu.get_tpu_info(), "vmem_capacity_bytes", None)
        if cap:
            return int(cap)
    except Exception:
        pass
    return 64 << 20   # conservative fallback (v7x per-TC VMEM)


def _pick_block_q(S, D, in_itemsize, has_bias, return_prob, prob_itemsize, vmem_cap):
    """Largest 128-aligned query tile dividing S whose per-step footprint fits VMEM."""
    budget = int(vmem_cap * 0.8)                       # headroom for internal scratch
    kv_resident = 2 * 2 * S * D * in_itemsize          # K, V double-buffered, resident over qi

    def footprint(tq):
        per = 2 * tq * D * in_itemsize                 # q tile (double-buffered)
        per += 2 * tq * D * in_itemsize                # ctx tile
        if has_bias:
            per += 2 * tq * S * 2                      # bf16 additive-bias tile
        if return_prob:
            per += 2 * tq * S * prob_itemsize          # attn_prob tile
        per += 3 * tq * S * 4                          # f32 scores / exp / probs temporaries
        return kv_resident + per

    for cand in (512, 256, 128):
        if S % cand == 0 and footprint(cand) <= budget:
            return cand, footprint(cand)
    if S % 128 == 0:
        return 128, footprint(128)
    # TODO(synk): pad S to a multiple of 128 (or add a key-axis online-softmax grid
    # dim) for large sequence lengths that are neither 128-aligned nor VMEM-friendly.
    return S, footprint(S)


def scaled_dot_product_attention(q, k, v, attn_mask=None, *, d_head=None,
                                 causal=False, return_prob=True,
                                 prob_dtype=jnp.bfloat16, approx_recip=True):
    """GPT-1 scaled dot-product attention.

    q, k, v: [B, H, S, D].  attn_mask: boolean-like, broadcastable to [B, H, S, S]
    (nonzero == masked); ignored when causal=True (mask generated in-kernel).
    Returns (context, attn_prob) like the PyTorch module, or just context when
    return_prob=False (drops the dominant B*H*S*S HBM write stream).
    """
    B, H, S, D = q.shape
    if d_head is None:
        d_head = D
    scale = 1.0 / (d_head ** 0.5)
    BH = B * H

    qf = q.reshape(BH, S, D)
    kf = k.reshape(BH, S, D)
    vf = v.reshape(BH, S, D)

    in_itemsize = jnp.dtype(q.dtype).itemsize
    prob_itemsize = jnp.dtype(prob_dtype).itemsize
    has_bias = not causal

    # ---- mask -> de-duplicated bf16 additive bias (non-causal path) ----------
    inputs = [qf, kf, vf]
    bias_idx = None
    if has_bias:
        if attn_mask is None:
            raise ValueError("attn_mask is required when causal=False")
        mask = jnp.asarray(attn_mask)
        if mask.ndim == 2:
            mask = mask[None]                                   # (1, S, S): shared
        elif mask.ndim == 3:
            pass                                                # (1|B|B*H, S, S)
        elif mask.ndim == 4:
            mb, mh = mask.shape[:2]
            if mb == 1 and mh == 1:
                mask = mask.reshape(1, S, S)                    # shared across B*H
            elif mh == 1:
                mask = mask.reshape(mb, S, S)                   # per-batch pad mask
            else:
                mask = jnp.broadcast_to(mask, (B, H, S, S)).reshape(BH, S, S)
        else:
            raise ValueError(f"attn_mask rank {mask.ndim} unsupported")
        # (mask != 0) preserves the nonzero-means-masked contract for float masks.
        bias = jnp.where(mask != 0, jnp.float32(_NEG_INF), jnp.float32(0.0))
        bias = bias.astype(jnp.bfloat16)                        # halves the mask stream
        n_mask = bias.shape[0]
        if n_mask == 1:
            bias_idx = lambda b, qi: (0, qi, 0)
        elif n_mask == B:
            bias_idx = lambda b, qi: (b // H, qi, 0)
        else:
            bias_idx = lambda b, qi: (b, qi, 0)
        inputs.append(bias)

    vmem_cap = _vmem_capacity_bytes()
    TQ, vmem_footprint = _pick_block_q(S, D, in_itemsize, has_bias,
                                       return_prob, prob_itemsize, vmem_cap)
    num_q_blocks = S // TQ

    kernel = functools.partial(_sdpa_kernel, scale=scale, block_q=TQ,
                               causal=causal, return_prob=return_prob,
                               approx_recip=approx_recip)

    in_specs = [
        pl.BlockSpec((1, TQ, D), lambda b, qi: (b, qi, 0)),   # q tile
        pl.BlockSpec((1, S, D), lambda b, qi: (b, 0, 0)),     # k (resident over qi)
        pl.BlockSpec((1, S, D), lambda b, qi: (b, 0, 0)),     # v (resident over qi)
    ]
    if has_bias:
        in_specs.append(pl.BlockSpec((1, TQ, S), bias_idx))   # shared bf16 bias tile

    out_shape = [jax.ShapeDtypeStruct((BH, S, D), q.dtype)]
    out_specs = [pl.BlockSpec((1, TQ, D), lambda b, qi: (b, qi, 0))]
    if return_prob:
        out_shape.append(jax.ShapeDtypeStruct((BH, S, S), prob_dtype))
        out_specs.append(pl.BlockSpec((1, TQ, S), lambda b, qi: (b, qi, 0)))

    # Advisory cost estimate: K/V read once per (b,h), bias re-read every q tile,
    # prob write counted at its actual dtype.
    bytes_accessed = (qf.size + kf.size + vf.size + BH * S * D) * in_itemsize
    if has_bias:
        bytes_accessed += BH * S * S * 2
    if return_prob:
        bytes_accessed += BH * S * S * prob_itemsize
    cost = pl.CostEstimate(flops=4 * BH * S * S * D,
                           transcendentals=BH * S * S,
                           bytes_accessed=int(bytes_accessed))

    vmem_limit = int(min(vmem_cap * 0.9, max(32 << 20, 2 * vmem_footprint)))

    # NOTE: grid = (BH, num_q_blocks) keeps K/V resident across the inner q-tile
    # axis; both axes are "parallel" so v7x megacore can shard either one.
    # TODO(synk): lane-dense (TQ, H*D) ctx slab for D < 128, and a key-tiled
    # online-softmax (flash) variant once S is too large for full-S K/V residency
    # on v7x's 64 MiB VMEM.
    outs = pl.pallas_call(
        kernel,
        out_shape=out_shape,
        grid_spec=pltpu.PrefetchScalarGridSpec(
            num_scalar_prefetch=0,
            grid=(BH, num_q_blocks),
            in_specs=in_specs,
            out_specs=out_specs,
        ),
        compiler_params=pltpu.CompilerParams(
            dimension_semantics=("parallel", "parallel"),
            vmem_limit_bytes=vmem_limit,
        ),
        cost_estimate=cost,
    )(*inputs)

    ctx = outs[0].reshape(B, H, S, D)
    if return_prob:
        return ctx, outs[1].reshape(B, H, S, S)
    return ctx


def _reference(q, k, v, attn_mask, d_head):
    scale = 1.0 / (d_head ** 0.5)
    scores = jnp.einsum("bhqd,bhkd->bhqk", q, k).astype(jnp.float32) * scale
    mask = jnp.broadcast_to(jnp.asarray(attn_mask, dtype=jnp.bool_), scores.shape)
    scores = jnp.where(mask, _NEG_INF, scores)
    probs = jax.nn.softmax(scores, axis=-1)
    ctx = jnp.einsum("bhqk,bhkd->bhqd", probs, v.astype(jnp.float32))
    return ctx.astype(q.dtype), probs


if __name__ == "__main__":
    B, H, S, D = 2, 2, 8, 32  # small shapes: batch=2, heads=2, seq=8, d_head=32

    key = jax.random.PRNGKey(0)
    kq, kk, kv = jax.random.split(key, 3)
    q = jax.random.normal(kq, (B, H, S, D), dtype=jnp.float32)
    k = jax.random.normal(kk, (B, H, S, D), dtype=jnp.float32)
    v = jax.random.normal(kv, (B, H, S, D), dtype=jnp.float32)

    # Causal mask (True == masked), shared across batch/heads.
    causal_mask = jnp.triu(jnp.ones((S, S), dtype=jnp.bool_), k=1)
    attn_mask = causal_mask[None, None]

    ref_ctx, ref_prob = _reference(q, k, v, attn_mask, D)

    # 1) Causal fast path: mask generated in-kernel, no mask DMA at all.
    ctx_c, prob_c = scaled_dot_product_attention(q, k, v, d_head=D, causal=True)
    # 2) General-mask path: de-duplicated bf16 additive bias.
    ctx_m, prob_m = scaled_dot_product_attention(q, k, v, attn_mask, d_head=D)
    # 3) Context-only path: dominant B*H*S*S prob write removed.
    ctx_only = scaled_dot_product_attention(q, k, v, attn_mask, d_head=D,
                                            return_prob=False)

    jax.block_until_ready((ctx_c, prob_c, ctx_m, prob_m, ctx_only))

    # bf16 matmul operands + bf16 attn_prob + approx reciprocal -> compare with
    # correspondingly loose tolerances against the f32 reference.
    tol = dict(atol=3e-2, rtol=3e-2)
    assert jnp.allclose(ctx_c, ref_ctx, **tol), "context mismatch (causal path)"
    assert jnp.allclose(prob_c.astype(jnp.float32), ref_prob, **tol), \
        "attn_prob mismatch (causal path)"
    assert jnp.allclose(ctx_m, ref_ctx, **tol), "context mismatch (mask path)"
    assert jnp.allclose(prob_m.astype(jnp.float32), ref_prob, **tol), \
        "attn_prob mismatch (mask path)"
    assert jnp.allclose(ctx_only, ref_ctx, **tol), "context mismatch (ctx-only path)"

    print("KERNEL_OK")
</pallas_src>

<mosaic_0001>
module attributes {stable_mosaic.version = 11 : i64} {
  func.func @_sdpa_kernel(%arg0: i32, %arg1: i32, %arg2: memref<1x8x32xf32, #tpu.memory_space<vmem>>, %arg3: memref<1x8x32xf32, #tpu.memory_space<vmem>>, %arg4: memref<1x8x32xf32, #tpu.memory_space<vmem>>, %arg5: memref<1x8x32xf32, #tpu.memory_space<vmem>>, %arg6: memref<1x8x8xbf16, #tpu.memory_space<vmem>>) attributes {dimension_semantics = [#tpu.dimension_semantics<parallel>, #tpu.dimension_semantics<parallel>], iteration_bounds = array<i64: 4, 1>, scalar_prefetch = 0 : i64, scratch_operands = 0 : i64, tpu.core_type = #tpu.core_type<tc>, window_params = [{transform_indices = @transform_0, window_bounds = array<i64: 1, 8, 32>}, {transform_indices = @transform_1, window_bounds = array<i64: 1, 8, 32>}, {transform_indices = @transform_2, window_bounds = array<i64: 1, 8, 32>}, {transform_indices = @transform_3, window_bounds = array<i64: 1, 8, 32>}, {transform_indices = @transform_4, window_bounds = array<i64: 1, 8, 8>}]} {
    %c0 = arith.constant 0 : index
    %c0_0 = arith.constant 0 : index
    %c0_1 = arith.constant 0 : index
    %0 = vector.load %arg2[%c0, %c0_0, %c0_1] : memref<1x8x32xf32, #tpu.memory_space<vmem>>, vector<1x8x32xf32>
    %1 = vector.shape_cast %0 : vector<1x8x32xf32> to vector<8x32xf32>
    %cst = arith.constant 0.176776692 : f32
    %2 = vector.broadcast %cst : f32 to vector<8x32xf32>
    %3 = arith.mulf %1, %2 : vector<8x32xf32>
    %4 = arith.truncf %3 : vector<8x32xf32> to vector<8x32xbf16>
    %c0_2 = arith.constant 0 : index
    %c0_3 = arith.constant 0 : index
    %c0_4 = arith.constant 0 : index
    %5 = vector.load %arg3[%c0_2, %c0_3, %c0_4] : memref<1x8x32xf32, #tpu.memory_space<vmem>>, vector<1x8x32xf32>
    %6 = vector.shape_cast %5 : vector<1x8x32xf32> to vector<8x32xf32>
    %7 = arith.truncf %6 : vector<8x32xf32> to vector<8x32xbf16>
    %c0_5 = arith.constant 0 : index
    %c0_6 = arith.constant 0 : index
    %c0_7 = arith.constant 0 : index
    %8 = vector.load %arg4[%c0_5, %c0_6, %c0_7] : memref<1x8x32xf32, #tpu.memory_space<vmem>>, vector<1x8x32xf32>
    %9 = vector.shape_cast %8 : vector<1x8x32xf32> to vector<8x32xf32>
    %10 = arith.truncf %9 : vector<8x32xf32> to vector<8x32xbf16>
    %cst_8 = arith.constant dense<0.000000e+00> : vector<8x8xf32>
    %11 = tpu.matmul %4, %7, %cst_8 {dimension_numbers = #tpu.dot_dimension_numbers<[1], [1], [0], [0], [0, 0, 1, 0], [], []>} : vector<8x32xbf16>, vector<8x32xbf16>, vector<8x8xf32> -> vector<8x8xf32>
    %c8_i32 = arith.constant 8 : i32
    %12 = arith.muli %arg1, %c8_i32 : i32
    %13 = tpu.iota {dimensions = array<i32: 0>} : vector<8x8xi32>
    %14 = vector.broadcast %12 : i32 to vector<8x8xi32>
    %15 = arith.addi %13, %14 : vector<8x8xi32>
    %16 = tpu.iota {dimensions = array<i32: 1>} : vector<8x8xi32>
    %17 = arith.cmpi sgt, %16, %15 : vector<8x8xi32>
    %cst_9 = arith.constant -1.000000e+09 : f32
    %18 = vector.broadcast %cst_9 : f32 to vector<8x8xf32>
    %19 = arith.select %17, %18, %11 : vector<8x8xi1>, vector<8x8xf32>
    %cst_10 = arith.constant dense<0xFF800000> : vector<8xf32>
    %20 = vector.multi_reduction <maximumf>, %19, %cst_10 [1] : vector<8x8xf32> to vector<8xf32>
    %21 = vector.shape_cast %20 : vector<8xf32> to vector<8x1xf32>
    %22 = vector.broadcast %21 : vector<8x1xf32> to vector<8x8xf32>
    %23 = arith.subf %19, %22 : vector<8x8xf32>
    %24 = math.exp %23 : vector<8x8xf32>
    %cst_11 = arith.constant dense<0.000000e+00> : vector<8xf32>
    %25 = vector.multi_reduction <add>, %24, %cst_11 [1] : vector<8x8xf32> to vector<8xf32>
    %26 = vector.shape_cast %25 : vector<8xf32> to vector<8x1xf32>
    %27 = tpu.reciprocal %26 {approx = true} : vector<8x1xf32> -> vector<8x1xf32>
    %28 = vector.broadcast %27 : vector<8x1xf32> to vector<8x8xf32>
    %29 = arith.mulf %24, %28 : vector<8x8xf32>
    %30 = arith.truncf %29 : vector<8x8xf32> to vector<8x8xbf16>
    %cst_12 = arith.constant dense<0.000000e+00> : vector<8x32xf32>
    %31 = tpu.matmul %30, %10, %cst_12 {dimension_numbers = #tpu.dot_dimension_numbers<[1], [0], [0], [1], [0, 0, 1, 1], [], []>} : vector<8x8xbf16>, vector<8x32xbf16>, vector<8x32xf32> -> vector<8x32xf32>
    %c0_13 = arith.constant 0 : index
    %c0_14 = arith.constant 0 : index
    %c0_15 = arith.constant 0 : index
    %32 = vector.load %arg5[%c0_13, %c0_14, %c0_15] : memref<1x8x32xf32, #tpu.memory_space<vmem>>, vector<1x8x32xf32>
    %33 = vector.shape_cast %32 : vector<1x8x32xf32> to vector<8x32xf32>
    %34 = vector.shape_cast %31 : vector<8x32xf32> to vector<1x8x32xf32>
    tpu.vector_store %arg5[%c0_13, %c0_14, %c0_15], %34 {strides = array<i32>} : memref<1x8x32xf32, #tpu.memory_space<vmem>>, vector<1x8x32xf32>,
    %35 = arith.truncf %29 : vector<8x8xf32> to vector<8x8xbf16>
    %c0_16 = arith.constant 0 : index
    %c0_17 = arith.constant 0 : index
    %c0_18 = arith.constant 0 : index
    %36 = vector.load %arg6[%c0_16, %c0_17, %c0_18] : memref<1x8x8xbf16, #tpu.memory_space<vmem>>, vector<1x8x8xbf16>
    %37 = vector.shape_cast %36 : vector<1x8x8xbf16> to vector<8x8xbf16>
    %38 = vector.shape_cast %35 : vector<8x8xbf16> to vector<1x8x8xbf16>
    tpu.vector_store %arg6[%c0_16, %c0_17, %c0_18], %38 {strides = array<i32>} : memref<1x8x8xbf16, #tpu.memory_space<vmem>>, vector<1x8x8xbf16>,
    return
  }
  func.func @transform_0(%arg0: i32, %arg1: i32) -> (i32, i32, i32) {
    %c0_i32 = arith.constant 0 : i32
    %c0_i32_0 = arith.constant 0 : i32
    return %arg0, %arg1, %c0_i32 : i32, i32, i32
  }
  func.func @transform_1(%arg0: i32, %arg1: i32) -> (i32, i32, i32) {
    %c0_i32 = arith.constant 0 : i32
    %c0_i32_0 = arith.constant 0 : i32
    %c0_i32_1 = arith.constant 0 : i32
    return %arg0, %c0_i32, %c0_i32_0 : i32, i32, i32
  }
  func.func @transform_2(%arg0: i32, %arg1: i32) -> (i32, i32, i32) {
    %c0_i32 = arith.constant 0 : i32
    %c0_i32_0 = arith.constant 0 : i32
    %c0_i32_1 = arith.constant 0 : i32
    return %arg0, %c0_i32, %c0_i32_0 : i32, i32, i32
  }
  func.func @transform_3(%arg0: i32, %arg1: i32) -> (i32, i32, i32) {
    %c0_i32 = arith.constant 0 : i32
    %c0_i32_0 = arith.constant 0 : i32
    return %arg0, %arg1, %c0_i32 : i32, i32, i32
  }
  func.func @transform_4(%arg0: i32, %arg1: i32) -> (i32, i32, i32) {
    %c0_i32 = arith.constant 0 : i32
    %c0_i32_0 = arith.constant 0 : i32
    return %arg0, %arg1, %c0_i32 : i32, i32, i32
  }
}

</mosaic_0001>

<bundles_post_ra>
// kernel: tpu_custom_call.1
= control target key start
LH: loop header
LB: loop body
LE: loop exit
PB: predicated region body
PF: predicated region fallthrough
CT: control target
= control target key end

     0   :  { %s1289_s0 = inlined_call_operand.hbm [shape: f32[4,8,32], index: 0, kind: input, shape index: {}]   ;;  %s1290_s1 = inlined_call_operand.hbm [shape: f32[4,8,32], index: 1, kind: input, shape index: {}]   ;;  %s1291_s2 = inlined_call_operand.hbm [shape: f32[4,8,32], index: 2, kind: input, shape index: {}]   ;;  %s1292_s3 = inlined_call_operand.hbm [shape: f32[4,8,32], index: 3, kind: output, shape index: {0}]   ;;  %s1293_s4 = inlined_call_operand.hbm [shape: bf16[4,8,8], index: 4, kind: output, shape index: {1}]  }
   0x1   :  { %1301 = sst [smem:[#allocation19_spill]] %s1290_s1 }
   0x2   :  { %10 = vsyncpa [#allocation3], 0 }
   0x3   :  { %12 = vsyncpa [#allocation3 + $0x1], 0 }
   0x4   :  { %13 = vsyncpa [#allocation6], 0 }
   0x5   :  { %15 = vsyncpa [#allocation6 + $0x1], 0 }
   0x6   :  { %16 = vsyncpa [#allocation4], 0 }
   0x7   :  { %18 = vsyncpa [#allocation4 + $0x1], 0 }
   0x8   :  { %19 = vsyncpa [#allocation10], 0 }
   0x9   :  { %21 = vsyncpa [#allocation10 + $0x1], 0  ;;  %s996_s15 = smov 0   ;;  %s998_s16 = smov 0  }
   0xa   :  { %s1000_s17 = smov 0   ;;  %s1002_s18 = smov 0  }
   0xb   :  { %s1004_s19 = smov 0   ;;  %s1006_s20 = smov 0  }
   0xc LB: > { %1302 = sst [smem:[#allocation15_spill]] %s958_s19  ;;  %s1027_s21 = sadd.s32 4294967295, %s962_s20   ;;  %s962_s20 = sphi %s1006_s20, %s27_s20   ;;  %s958_s19 = sphi %s1004_s19, %s1325_s19   ;;  %s954_s18 = sphi %s1002_s18, %s1324_s18   ;;  %s950_s17 = sphi %s1000_s17, %s1328_s17   ;;  %s946_s16 = sphi %s998_s16, %s1327_s16   ;;  %s942_s15 = sphi %s996_s15, %s1326_s15  }
   0xd   : > { %s632_s22 = sadd.s32 4294967294, %s962_s20   ;;  %s39_s23 = sadd.s32 1, %s958_s19 }
   0xe   : > { %s48_s24 = sadd.s32 1, %s950_s17  ;;  %p41_p0 = scmp.ge.s32.totalorder %s39_s23, 4 }
   0xf   : > { %p55_p1 = scmp.ne.s32.totalorder %s950_s17, %s946_s16  ;;  %p56_p2 = scmp.eq.s32.totalorder %s962_s20, 0 }
  0x10   : > { %p61_p3 = scmp.ne.s32.totalorder %s946_s16, %s942_s15  ;;  %s1330_s23 = smov (%p41_p0, %s39_s23), 0 }
  0x11   : > { %1303 = sst [smem:[#allocation16_spill]] %s1330_s23  ;;  %p1039_p4 = por %p56_p2, %p55_p1 }
  0x12   : > { %p62_p5 = scmp.eq.s32.totalorder %s1027_s21, 0  ;;  %s43_s26 = ssub.s32 %s958_s19, %s1330_s23 }
  0x13   : > { %p139_p6 = scmp.eq.s32.totalorder %s1027_s21, 3  ;;  %p46_p7 = scmp.eq.s32.totalorder %s43_s26, 0 }
  0x14   : > { %p1047_p8 = por %p62_p5, %p61_p3  ;;  %p145_p10 = scmp.eq.s32.totalorder %s632_s22, 3 }
  0x15   : > { %p1051_p9 = por %p139_p6, %p55_p1  ;;  %p698_p12 = scmp.lt.s32.totalorder %s962_s20, 4 }
  0x16   : > { %s1305_s27 = scalar_select %p1047_p8, 1, 0 }
  0x17   : > { %s1306_s28 = scalar_select %p1051_p9, 1, 0 }
  0x18   : > { %s1056_s29 = scalar_select %p46_p7, %s950_s17, %s48_s24  }
  0x19   : > { %p1058_p11 = por %p145_p10, %p61_p3  ;;  %s1294_s5 = sand.u32 1, %s950_s17  }
  0x1a   : > { %1307 = sst [smem:[#allocation17_spill]] %s1056_s29  ;;  %s1066_s6 = sshll.u32 %s1294_s5, 3 }
  0x1b   : > { %s1308_s30 = scalar_select %p1058_p11, 1, 0 }
  0x1c   : > { %s1069_s7 = sshll.u32 %s958_s19, 7  ;;  %p1073_p13 = pnand %p698_p12, %p1039_p4 }
  0x1d   : > { %1309 = sst [smem:[#allocation18_spill]] %s1308_s30  ;;  %s212_s9 = sand.u32 1, %s962_s20  }
  0x1e   : > { %s1310_s8 = scalar_select %p1073_p13, 1, 0 }
  0x1f   : > { %s1311_s1 = sld [smem:[#allocation19_spill]]  ;;  %s216_s13 = scalar_lea.vmem [#allocation5], %s1066_s6 }
  0x20   : > { %s223_s14 = sshll.u32 %s216_s13, 4  ;;  %s1089_s22 = scalar_lea.sflag [#allocation6], %s212_s9  ;;  %s1086_s14 = int_to_ptr.vmem [resolvable:$true] %s223_s14 }
  0x21   : > { %p1095_p3 = pneg %p1073_p13 }
  0x25   : > { %s1082_s12 = scalar_lea.hbm %s1311_s1, %s1069_s7  ;;  %s759_s11 = scalar_lea.hbm %s1311_s1, 512 }
  0x26   : > { %s754_s24 = scalar_lea.hbm %s1082_s12, 128  ;;  %p760_p6 = scmp.lt.u32.totalorder %s1082_s12, %s1311_s1 }
  0x27   : > { %p755_p2 = scmp.ne.s32.totalorder %s1082_s12, %s754_s24  ;;  %p761_p7 = scmp.lt.u32.totalorder %s759_s11, %s754_s24 }
  0x28   : > { %p763_p12 = scmp.lt.u32.totalorder %s754_s24, %s1082_s12 }
  0x29   : > { %p757_p4 = pnand %p1095_p3, %p755_p2  ;;  %p762_p10 = por %p761_p7, %p760_p6 }
  0x2b   : > { %p758_p5 = pneg %p757_p4  ;;  %p764_p0 = por %p763_p12, %p762_p10 }
  0x2d   : > { %p765_p1 = pnand %p764_p0, %p758_p5 }
  0x2f   : > { %768 = shalt.err (!%p765_p1)
}
  0x30   : > { %s769_s9 = scalar_lea.vmem %s1086_s14, 128  ;;  %s964_s26 = smov [#allocation5]  }
  0x31   : > { %p770_p2 = scmp.ne.s32.totalorder %s1086_s14, %s769_s9  ;;  %s774_s10 = sshll.u32 %s964_s26, 4  ;;  %s775_s10 = int_to_ptr.vmem [resolvable:$false] %s774_s10 }
  0x32   : > { %s776_s5 = scalar_lea.vmem %s775_s10, 256  ;;  %p777_p9 = scmp.lt.s32.totalorder %s1086_s14, %s775_s10 }
  0x33   : > { %p772_p4 = pnand %p770_p2, %p1095_p3  ;;  %p778_p8 = scmp.lt.s32.totalorder %s776_s5, %s769_s9 }
  0x35   : > { %p773_p11 = pneg %p772_p4  ;;  %p779_p6 = por %p778_p8, %p777_p9 }
  0x37   : > { %p780_p7 = pnand %p779_p6, %p773_p11 }
  0x39   : > { %783 = shalt.err (!%p780_p7)
}
  0x3a   : > { %687 = dma.hbm_to_vmem [thread:$0]  (!%p1073_p13), %s1082_s12, 128, %s1086_s14, %s1089_s22  }
  0x3b   : > { %p1313_p0 = scmp.lt.s32.totalorder %s962_s20, 5  ;;  %p1314_p1 = scmp.ge.s32.totalorder %s962_s20, 1 }
  0x3c   : > { %s1131_s9 = scalar_lea.hbm %s1289_s0, %s1069_s7  ;;  %s197_s26 = scalar_lea.vmem [#allocation2], %s1066_s6 }
  0x3d   : > { %p1123_p5 = pnand %p1314_p1, %p1313_p0  ;;  %s205_s10 = sshll.u32 %s197_s26, 4  ;;  %s1134_s10 = int_to_ptr.vmem [resolvable:$true] %s205_s10 }
  0x3e   : > { %s1140_s5 = scalar_lea.hbm %s1291_s2, %s1069_s7  ;;  %s1316_s1 = sand.u32 1, %s950_s17  }
  0x3f   : > { %s1315_s24 = scalar_select %p1123_p5, 1, 0 }
  0x40   : > { %s194_s23 = scalar_lea.sflag [#allocation3], %s1316_s1  ;;  %s784_s19 = scalar_lea.hbm %s1131_s9, 128 }
  0x41   : > { %p785_p8 = scmp.ne.s32.totalorder %s1131_s9, %s784_s19  ;;  %s789_s29 = scalar_lea.hbm %s1289_s0, 512 }
  0x42   : > { %p790_p10 = scmp.lt.u32.totalorder %s1131_s9, %s1289_s0  ;;  %p791_p12 = scmp.lt.u32.totalorder %s789_s29, %s784_s19 }
  0x43   : > { %p787_p9 = pnand %p785_p8, %p1095_p3  ;;  %p793_p4 = scmp.lt.u32.totalorder %s784_s19, %s1131_s9 }
  0x44   : > { %p792_p2 = por %p791_p12, %p790_p10 }
  0x45   : > { %p788_p11 = pneg %p787_p9 }
  0x46   : > { %p794_p6 = por %p793_p4, %p792_p2 }
  0x48   : > { %p795_p7 = pnand %p794_p6, %p788_p11 }
  0x4a   : > { %798 = shalt.err (!%p795_p7)
}
  0x4b   : > { %s799_s1 = scalar_lea.vmem %s1134_s10, 128  ;;  %s965_s7 = smov [#allocation2]  }
  0x4c   : > { %p800_p0 = scmp.ne.s32.totalorder %s1134_s10, %s799_s1  ;;  %s804_s12 = sshll.u32 %s965_s7, 4  ;;  %s805_s12 = int_to_ptr.vmem [resolvable:$false] %s804_s12 }
  0x4d   : > { %s806_s30 = scalar_lea.vmem %s805_s12, 256  ;;  %p807_p9 = scmp.lt.s32.totalorder %s1134_s10, %s805_s12 }
  0x4e   : > { %p802_p1 = pnand %p800_p0, %p1095_p3  ;;  %p808_p5 = scmp.lt.s32.totalorder %s806_s30, %s799_s1 }
  0x50   : > { %p803_p8 = pneg %p802_p1  ;;  %p809_p10 = por %p808_p5, %p807_p9 }
  0x52   : > { %p810_p12 = pnand %p809_p10, %p803_p8 }
  0x54   : > { %813 = shalt.err (!%p810_p12)
}
  0x55   : > { %684 = dma.hbm_to_vmem [thread:$0]  (!%p1073_p13), %s1131_s9, 128, %s1134_s10, %s194_s23  }
  0x56   : > { %s234_s19 = scalar_lea.vmem [#allocation7], %s1066_s6  ;;  %s814_s14 = scalar_lea.hbm %s1140_s5, 128 }
  0x57   : > { %s241_s29 = sshll.u32 %s234_s19, 4  ;;  %p815_p11 = scmp.ne.s32.totalorder %s1140_s5, %s814_s14  ;;  %s242_s29 = int_to_ptr.vmem [resolvable:$true] %s241_s29 }
  0x58   : > { %s819_s26 = scalar_lea.hbm %s1291_s2, 512  ;;  %p820_p4 = scmp.lt.u32.totalorder %s1140_s5, %s1291_s2 }
  0x59   : > { %p817_p5 = pnand %p815_p11, %p1095_p3  ;;  %p821_p6 = scmp.lt.u32.totalorder %s819_s26, %s814_s14 }
  0x5a   : > { %p823_p0 = scmp.lt.u32.totalorder %s814_s14, %s1140_s5 }
  0x5b   : > { %p818_p2 = pneg %p817_p5  ;;  %p822_p7 = por %p821_p6, %p820_p4 }
  0x5d   : > { %p824_p1 = por %p823_p0, %p822_p7 }
  0x5f   : > { %p825_p8 = pnand %p824_p1, %p818_p2 }
  0x61   : > { %828 = shalt.err (!%p825_p8)
}
  0x62   : > { %s829_s23 = scalar_lea.vmem %s242_s29, 128  ;;  %s966_s6 = smov [#allocation7]  }
  0x63   : > { %p830_p9 = scmp.ne.s32.totalorder %s242_s29, %s829_s23  ;;  %s834_s9 = sshll.u32 %s966_s6, 4  ;;  %s835_s9 = int_to_ptr.vmem [resolvable:$false] %s834_s9 }
  0x64   : > { %s836_s10 = scalar_lea.vmem %s835_s9, 256  ;;  %p837_p11 = scmp.lt.s32.totalorder %s242_s29, %s835_s9 }
  0x65   : > { %p832_p10 = pnand %p830_p9, %p1095_p3  ;;  %p838_p5 = scmp.lt.s32.totalorder %s836_s10, %s829_s23 }
  0x67   : > { %p833_p12 = pneg %p832_p10  ;;  %p839_p13 = por %p838_p5, %p837_p11 }
  0x69   : > { %p840_p4 = pnand %p839_p13, %p833_p12 }
  0x6b   : > { %843 = shalt.err (!%p840_p4)
}
  0x6c   : > { %p1317_p6 = scmp.ne.s32.totalorder %s1310_s8, 0  ;;  %p1318_p2 = scmp.ne.s32.totalorder %s1315_s24, 0 }
  0x6d   : > { %s1187_s25 = sand.u32 (!%p1318_p2), 1, %s946_s16   ;;  %p1319_p13 = scmp.ne.s32.totalorder (!%p1318_p2), %s1305_s27, 0 }
  0x6e   : > { %690 = dma.hbm_to_vmem [thread:$0]  (!%p1317_p6), %s1140_s5, 128, %s242_s29, %s1089_s22  }
  0x6f   : > { %250 = sbr.rel (%p1318_p2) target bundleno = 889 (0x379), region = 32  ;;  %s1190_s12 = sshll.u32 (!%p1318_p2), %s1187_s25, 3 }
  0x70   : > { %s253_s30 = scalar_lea.sflag (!%p1318_p2), [#allocation3], %s1187_s25  ;;  %s256_s19 = scalar_lea.vmem (!%p1318_p2), [#allocation2], %s1190_s12 }
  0x76   : > { %925 = dma.done.wait (%p1319_p13), %s253_s30, 128  }
  0x77   : > { %927 = vsyncadd (%p1319_p13), %s253_s30, 4294967168  ;;  %s261_s8 = sand.u32 1, %s1027_s21   ;;  %s265_s24 = scalar_lea.vmem [#allocation5], %s1190_s12 }
  0x78   : > { %s262_s22 = scalar_lea.sflag [#allocation6], %s261_s8 }
  0x79   : > { %929 = dma.done.wait (%p1319_p13), %s262_s22, 256  }
  0x7a   : > { %931 = vsyncadd (%p1319_p13), %s262_s22, 4294967040  ;;  %v967_v0 = vmov 0.0   ;;  %vm968_vm0 = vmmov 0   ;;  %v318_v1 = vld [vmem:[%s265_s24] sm:$0xff]  ;;  %vm322_vm1 = vcmask 261120   ;;  %v315_v2 = vld [vmem:[%s256_s19] sm:$0xff]  ;;  %v370_v7 = vlaneseq }
  0x7b   : > { %659 = vmatprep.subr.bf16.mxu0 %v967_v0  ;;  %661 = vmatprep.mubr.msk.bf16.mxu0 %vm968_vm0, %v967_v0  ;;  %v319_v3 = vpack.c.bf16 %v318_v1, %v318_v1  ;;  %v316_v5 = vmul.f32 0.17677669, %v315_v2  ;;  %vm378_vm3 = vcmask 64512   ;;  %s274_s21 = scalar_lea.vmem [#allocation7], %s1190_s12  ;;  %vm394_vm4 = vcmask 1043456   ;;  %s646_s27 = sshll.u32 %s1187_s25, 2 }
  0x7c   : > { %665 = vmatprep.subr.bf16.mxu1 %v967_v0  ;;  %667 = vmatprep.mubr.msk.bf16.mxu1 %vm968_vm0, %v967_v0  ;;  %v371_v8 = vshrl.u32 %v370_v7, 7  ;;  %v375_v9 = vand.u32 127, %v370_v7  ;;  %v320_v21 = vld [vmem:[%s274_s21] sm:$0xff]  ;;  %vm439_vm5 = vcmask 60416   ;;  %s313_s5 = scalar_lea.vmem [#allocation9], %s646_s27  ;;  %s652_s29 = sshll.u32 %s954_s18, 6 }
  0x7d   : > { %v327_v4 = vsel %vm322_vm1, %v319_v3, 0  ;;  %v317_v6 = vpack.c.bf16 %v316_v5, %v316_v5  ;;  %v321_v22 = vpack.c.bf16 %v320_v21, %v320_v21  ;;  %s475_s14 = sshll.u32 %s313_s5, 4  ;;  %s1215_s26 = scalar_lea.hbm %s1293_s4, %s652_s29  ;;  %s476_s14 = int_to_ptr.vmem [resolvable:$true] %s475_s14 }
  0x7e   : > { %660 = vmatpush3.bf16.xpose.msra.mxu0 %v327_v4  ;;  %vm376_vm2 = vcmp.gt.s32.totalorder %v375_v9, %v371_v8  ;;  %s447_s1 = scalar_lea.sflag [#allocation10], %s1187_s25  ;;  %s844_s7 = scalar_lea.vmem %s476_s14, 64 }
  0x7f   : > { %v396_v23 = vsel %vm394_vm4, %v321_v22, 0  ;;  %p845_p3 = scmp.ne.s32.totalorder %s476_s14, %s844_s7  ;;  %p1320_p7 = scmp.ne.s32.totalorder %s1306_s28, 0 }
  0x80   : > { %666 = vmatpush3.bf16.msra.mxu1 %v396_v23  ;;  %s969_s23 = smov [#allocation9]  }
  0x81   : > { %p846_p0 = pnand %p845_p3, %p1320_p7  ;;  %s848_s6 = sshll.u32 %s969_s23, 4  ;;  %s849_s6 = int_to_ptr.vmem [resolvable:$false] %s848_s6 }
  0x82   : > { %s850_s9 = scalar_lea.vmem %s849_s6, 128  ;;  %p851_p8 = scmp.lt.s32.totalorder %s476_s14, %s849_s6 }
  0x83   : > { %p847_p1 = pneg %p846_p0  ;;  %p852_p9 = scmp.lt.s32.totalorder %s850_s9, %s844_s7 }
  0x85   : > { %662 = vmatmul.mubr.msk.bf16.vlgmr.msra.gmra.mrb[0].mxu0 %vm322_vm1, %v317_v6  ;;  %p853_p10 = por %p852_p9, %p851_p8 }
  0x87   : > { %p854_p12 = pnand %p853_p10, %p847_p1 }
 0x158   : > { %v363_v10 = vpop.f32.mrb[0].mxu0 }
 0x159   : > { %v377_v11 = vsel %vm376_vm2, -1e+09, %v363_v10  ;;  %v663_v12 = vpop.f32.mrb[1].mxu0 }
 0x15a   : > { %v366_v13 = vpop.f32.mrb[2].mxu0  ;;  %v379_v14 = vsel %vm378_vm3, %v377_v11, -inf }
 0x15b   : > { %380 = vmax.xlane.f32.xlu0 %v379_v14  ;;  %v664_v15 = vpop.f32.mrb[3].mxu0 }
 0x1e8   : > { %v381_v16 = vpop.xlane.xlu0 %380 }
 0x1e9   : > { %v382_v17 = vsub.f32 %v377_v11, %v381_v16 }
 0x1eb   : > { %v383_v18 = vmul.f32 1.442695, %v382_v17 }
 0x1ed   : > { %750 = vpow2.f32 %v383_v18 }
 0x1f7   : > { %v751_v19 = vpop.eup %750 }
 0x1f8   : > { %v385_v20 = vsel %vm378_vm3, %v751_v19, 0.0 }
 0x1f9   : > { %386 = vadd.xlane.f32.xlu0 %v385_v20 }
 0x286   : > { %v387_v24 = vpop.xlane.xlu0 %386 }
 0x287   : > { %752 = vrcp.f32 %v387_v24 }
 0x291   : > { %v753_v25 = vpop.eup %752 }
 0x292   : > { %v389_v26 = vmul.f32 %v753_v25, %v751_v19 }
 0x294   : > { %v390_v27 = vpack.c.bf16 %v389_v26, %v389_v26 }
 0x296   : > { %668 = vmatmul.mubr.msk.bf16.vlgmr.msra.gmra.mrb[0].mxu1 %vm378_vm3, %v390_v27  ;;  %440 = vst.msk [vmem:[%s313_s5] sm:$0xf] %vm439_vm5, %v390_v27 }
 0x297   : > { %857 = shalt.err (!%p854_p12)
}
 0x298   : > { %s858_s10 = scalar_lea.hbm %s1215_s26, 64  ;;  %s862_s8 = scalar_lea.hbm %s1293_s4, 256 }
 0x299   : > { %p859_p11 = scmp.ne.s32.totalorder %s1215_s26, %s858_s10  ;;  %p863_p6 = scmp.lt.u32.totalorder %s1215_s26, %s1293_s4 }
 0x29a   : > { %p864_p2 = scmp.lt.u32.totalorder %s862_s8, %s858_s10  ;;  %p866_p3 = scmp.lt.u32.totalorder %s858_s10, %s1215_s26 }
 0x29b   : > { %p860_p5 = pnand %p859_p11, %p1320_p7 }
 0x29c   : > { %p865_p13 = por %p864_p2, %p863_p6 }
 0x29d   : > { %p861_p4 = pneg %p860_p5 }
 0x29e   : > { %p867_p0 = por %p866_p3, %p865_p13 }
 0x2a0   : > { %p868_p1 = pnand %p867_p0, %p861_p4 }
 0x2a2   : > { %871 = shalt.err (!%p868_p1)
}
 0x2a3   : > { %678 = dma.vmem_to_hbm [thread:$0]  (%p1320_p7), %s476_s14, 64, %s1215_s26, %s447_s1  }
 0x2a4   : > { %s651_s21 = sshll.u32 %s954_s18, 7  ;;  %s306_s27 = scalar_lea.vmem [#allocation8], %s1190_s12 }
 0x2a5   : > { %s461_s5 = sshll.u32 %s306_s27, 4  ;;  %s1240_s13 = scalar_lea.hbm %s1292_s3, %s651_s21  ;;  %s1242_s5 = int_to_ptr.vmem [resolvable:$true] %s461_s5 }
 0x2a6   : > { %s442_s7 = scalar_lea.sflag [#allocation4], %s1187_s25  ;;  %s872_s14 = scalar_lea.vmem %s1242_s5, 128 }
 0x2a7   : > { %p873_p8 = scmp.ne.s32.totalorder %s1242_s5, %s872_s14  ;;  %s970_s18 = smov [#allocation8]  }
 0x2a8   : > { %s876_s12 = sshll.u32 %s970_s18, 4  ;;  %s877_s12 = int_to_ptr.vmem [resolvable:$false] %s876_s12 }
 0x2a9   : > { %p874_p9 = pnand %p873_p8, %p1320_p7  ;;  %s878_s26 = scalar_lea.vmem %s877_s12, 256 }
 0x2aa   : > { %p879_p12 = scmp.lt.s32.totalorder %s1242_s5, %s877_s12  ;;  %p880_p11 = scmp.lt.s32.totalorder %s878_s26, %s872_s14 }
 0x2ab   : > { %p875_p10 = pneg %p874_p9 }
 0x2ac   : > { %p881_p5 = por %p880_p11, %p879_p12 }
 0x2ae   : > { %p882_p4 = pnand %p881_p5, %p875_p10 }
 0x369   : > { %v432_v28 = vpop.f32.mrb[0].mxu1 }
 0x36a   : > { %438 = vst.msk [vmem:[%s306_s27] sm:$0xff] %vm322_vm1, %v432_v28  ;;  %v669_v29 = vpop.f32.mrb[1].mxu1 }
 0x36b   : > { %v435_v30 = vpop.f32.mrb[2].mxu1 }
 0x36c   : > { %885 = shalt.err (!%p882_p4)
}
 0x36d   : > { %s886_s25 = scalar_lea.hbm %s1240_s13, 128  ;;  %s890_s6 = scalar_lea.hbm %s1292_s3, 512 }
 0x36e   : > { %p887_p6 = scmp.ne.s32.totalorder %s1240_s13, %s886_s25  ;;  %p891_p3 = scmp.lt.u32.totalorder %s1240_s13, %s1292_s3 }
 0x36f   : > { %p892_p0 = scmp.lt.u32.totalorder %s890_s6, %s886_s25  ;;  %p894_p8 = scmp.lt.u32.totalorder %s886_s25, %s1240_s13 }
 0x370   : > { %p888_p2 = pnand %p887_p6, %p1320_p7 }
 0x371   : > { %p893_p1 = por %p892_p0, %p891_p3 }
 0x372   : > { %p889_p13 = pneg %p888_p2 }
 0x373   : > { %p895_p9 = por %p894_p8, %p893_p1 }
 0x375   : > { %p896_p10 = pnand %p895_p9, %p889_p13 }
 0x377   : > { %899 = shalt.err (!%p896_p10)
}
 0x378   : > { %677 = dma.vmem_to_hbm [thread:$0]  (%p1320_p7), %s1242_s5, 128, %s1240_s13, %s442_s7   ;;  %v670_v31 = vpop.f32.mrb[3].mxu1 }
 0x379 PF: > { %s1321_s30 = sld [smem:[#allocation18_spill]]  ;;  %p699_p12 = scmp.ge.s32.totalorder %s962_s20, 2 }
 0x37a   : > { %s487_s19 = sand.u32 1, %s942_s15  }
 0x37b   : > { %s488_s8 = scalar_lea.sflag [#allocation4], %s487_s19 }
 0x37f   : > { %p1322_p11 = scmp.ne.s32.totalorder %s1321_s30, 0 }
 0x381   : > { %p692_p5 = pnand %p699_p12, %p1322_p11 }
 0x383   : > { %933 = dma.done.wait (!%p692_p5), %s488_s8, 128  }
 0x384   : > { %935 = vsyncadd (!%p692_p5), %s488_s8, 4294967168  ;;  %s497_s22 = scalar_lea.sflag [#allocation10], %s487_s19 }
 0x385   : > { %937 = dma.done.wait (!%p692_p5), %s497_s22, 64  }
 0x386   : > { %939 = vsyncadd (!%p692_p5), %s497_s22, 4294967232  ;;  %s27_s20 = sadd.s32 1, %s962_s20   ;;  %s1323_s28 = sld [smem:[#allocation17_spill]] }
 0x387   : > { %p24_p4 = scmp.ge.s32.totalorder %s27_s20, 6   ;;  %s1324_s18 = sld [smem:[#allocation15_spill]] }
 0x388   : > { %s1325_s19 = sld [smem:[#allocation16_spill]]  ;;  %s1326_s15 = smov %s946_s16 }
 0x389   : > { %s1327_s16 = smov %s950_s17  ;;  %26 = sbr.rel (!%p24_p4) target bundleno = 12 (0xc), region = 118 }
 0x38c   : > { %s1328_s17 = smov %s1323_s28 }
 0x390   :  { %502 = vsyncpa [#allocation3], 1 }
 0x391   :  { %504 = vsyncpa [#allocation3 + $0x1], 1 }
 0x392   :  { %505 = vsyncpa [#allocation6], 1 }
 0x393   :  { %507 = vsyncpa [#allocation6 + $0x1], 1 }
 0x394   :  { %508 = vsyncpa [#allocation4], 1 }
 0x395   :  { %510 = vsyncpa [#allocation4 + $0x1], 1 }
 0x396   :  { %511 = vsyncpa [#allocation10], 1 }
 0x397   :  { %513 = vsyncpa [#allocation10 + $0x1], 1 }

</bundles_post_ra>
